<compile_context>
chip_gen: v6e
topology: v6e:2x2x1
jax: 0.10.0
libtpu: 0.0.40
codegen_flags: <defaults>
</compile_context>

<pallas_src>
import functools
import math

import jax
import jax.numpy as jnp
from jax import lax
from jax.experimental import pallas as pl
from jax.experimental.pallas import tpu as pltpu


# ---------------------------------------------------------------------------
# 3x3 same-padding conv (Cin == Cout), NCHW, stride 1 — one Pallas kernel per level.
# ---------------------------------------------------------------------------
def _conv3x3_kernel(x_ref, w_ref, b_ref, o_ref, *, cin, H, W):
    # x_ref: (1, cin, H+2, W+2) VMEM  — one zero-padded input sample
    # w_ref: (cout*cin*9,)      SMEM  — flattened torch OIHW weights
    # b_ref: (cout,)            SMEM
    # o_ref: (1, 1, H, W)       VMEM  — one output-channel plane
    co = pl.program_id(1)
    acc = jnp.zeros((H, W), jnp.float32)
    for ci in range(cin):
        base = (co * cin + ci) * 9
        for dh in range(3):
            for dw in range(3):
                w = w_ref[base + dh * 3 + dw]                      # scalar from SMEM
                tap = x_ref[0, ci, dh:dh + H, dw:dw + W].astype(jnp.float32)
                acc = acc + w * tap                                # VPU FMA
    o_ref[0, 0, :, :] = (acc + b_ref[co]).astype(o_ref.dtype)


def conv3x3_same(x, w, b):
    """x: (N, C, H, W); w: (C, C, 3, 3) torch OIHW; b: (C,)."""
    N, Cin, H, W = x.shape
    Cout = w.shape[0]
    x_pad = jnp.pad(x, ((0, 0), (0, 0), (1, 1), (1, 1)))
    w_flat = w.reshape(-1).astype(jnp.float32)
    b_f32 = b.astype(jnp.float32)

    kernel = functools.partial(_conv3x3_kernel, cin=Cin, H=H, W=W)
    return pl.pallas_call(
        kernel,
        out_shape=jax.ShapeDtypeStruct((N, Cout, H, W), x.dtype),
        grid=(N, Cout),
        in_specs=[
            # one padded sample; index map ignores co -> block reused across co
            pl.BlockSpec((1, Cin, H + 2, W + 2), lambda n, co: (n, 0, 0, 0)),
            pl.BlockSpec(memory_space=pltpu.MemorySpace.SMEM),   # weights (scalars)
            pl.BlockSpec(memory_space=pltpu.MemorySpace.SMEM),   # bias (scalars)
        ],
        out_specs=pl.BlockSpec((1, 1, H, W), lambda n, co: (n, co, 0, 0)),
        compiler_params=pltpu.CompilerParams(
            dimension_semantics=("parallel", "parallel")),
    )(x_pad, w_flat, b_f32)


# ---------------------------------------------------------------------------
# Head: fc( sum_{H,W} relu(x) )  — fused relu + spatial reduction + matmul.
# ---------------------------------------------------------------------------
def _head_kernel(x_ref, w_ref, b_ref, o_ref):
    x = x_ref[...].astype(jnp.float32)                      # (N, C, H, W)
    pooled = jnp.sum(jnp.maximum(x, 0.0), axis=(2, 3))      # (N, C)
    out = jnp.dot(pooled, w_ref[...], preferred_element_type=jnp.float32)
    o_ref[...] = (out + b_ref[...]).astype(o_ref.dtype)


def relu_sum_fc(x, w_t, b):
    """x: (N, C, H, W); w_t: (C, V) = torch fc.weight.T; b: (V,)."""
    N = x.shape[0]
    V = w_t.shape[1]
    return pl.pallas_call(
        _head_kernel,
        out_shape=jax.ShapeDtypeStruct((N, V), jnp.float32),
        in_specs=[pl.BlockSpec(memory_space=pltpu.MemorySpace.VMEM)] * 3,
        out_specs=pl.BlockSpec(memory_space=pltpu.MemorySpace.VMEM),
    )(x, w_t.astype(jnp.float32), b.astype(jnp.float32).reshape(1, V))


# ---------------------------------------------------------------------------
# Stand-in encoder (plain JAX) + full forward
# ---------------------------------------------------------------------------
def _toy_encoder(x, filters):
    # TODO(synk): real encoder is an unspecified external module; this stand-in
    # produces level i by 2x average pooling i times and tiling channels.
    feats = []
    cur = x
    for i, ch in enumerate(filters):
        if i > 0:
            n, c, h, w = cur.shape
            cur = cur.reshape(n, c, h // 2, 2, w // 2, 2).mean(axis=(3, 5))
        c = cur.shape[1]
        reps = -(-ch // c)
        feats.append(jnp.tile(cur, (1, reps, 1, 1))[:, :ch])
    return feats


def anonimizer_forward(x, conv_ws, conv_bs, fc_w_t, fc_b, filters, reverse=False):
    xs = _toy_encoder(x, filters)
    xs = [conv3x3_same(f, w, b) for f, w, b in zip(xs, conv_ws, conv_bs)]
    head = relu_sum_fc(xs[-1], fc_w_t, fc_b)        # xs[-1]: last level in original order
    feats = xs[::-1] if reverse else xs
    return feats, head


def _reference(x, conv_ws, conv_bs, fc_w_t, fc_b, filters, reverse=False):
    xs = _toy_encoder(x, filters)
    outs = []
    for f, w, b in zip(xs, conv_ws, conv_bs):
        y = lax.conv_general_dilated(
            f.astype(jnp.float32), w.astype(jnp.float32),
            window_strides=(1, 1), padding="SAME",
            dimension_numbers=("NCHW", "OIHW", "NCHW"))
        outs.append(y + b.astype(jnp.float32)[None, :, None, None])
    pooled = jnp.sum(jnp.maximum(outs[-1], 0.0), axis=(2, 3))
    head = pooled @ fc_w_t.astype(jnp.float32) + fc_b.astype(jnp.float32)
    feats = outs[::-1] if reverse else outs
    return feats, head


if __name__ == "__main__":
    N, H, W = 2, 16, 16
    filters = [4, 8]
    last_vector = 16
    reverse = True

    key = jax.random.PRNGKey(0)
    keys = jax.random.split(key, 2 * len(filters) + 3)

    x = jax.random.normal(keys[0], (N, filters[0], H, W), dtype=jnp.float32)

    conv_ws, conv_bs = [], []
    for i, ch in enumerate(filters):
        bound = 1.0 / math.sqrt(ch * 9)
        conv_ws.append(jax.random.uniform(
            keys[1 + 2 * i], (ch, ch, 3, 3), minval=-bound, maxval=bound,
            dtype=jnp.float32))
        conv_bs.append(jax.random.uniform(
            keys[2 + 2 * i], (ch,), minval=-bound, maxval=bound,
            dtype=jnp.float32))

    fbound = 1.0 / math.sqrt(filters[-1])
    fc_w_t = jax.random.uniform(keys[-2], (filters[-1], last_vector),
                                minval=-fbound, maxval=fbound, dtype=jnp.float32)
    fc_b = jax.random.uniform(keys[-1], (last_vector,),
                              minval=-fbound, maxval=fbound, dtype=jnp.float32)

    feats, vec = anonimizer_forward(x, conv_ws, conv_bs, fc_w_t, fc_b,
                                    filters, reverse=reverse)
    jax.block_until_ready((feats, vec))

    ref_feats, ref_vec = _reference(x, conv_ws, conv_bs, fc_w_t, fc_b,
                                    filters, reverse=reverse)

    assert len(feats) == len(ref_feats)
    for a, r in zip(feats, ref_feats):
        assert a.shape == r.shape
        assert jnp.allclose(a, r, atol=1e-4, rtol=1e-4), "conv mismatch vs reference"
    assert vec.shape == (N, last_vector)
    assert jnp.allclose(vec, ref_vec, atol=1e-4, rtol=1e-4), "head mismatch vs reference"

    print("KERNEL_OK")
</pallas_src>

<mosaic_0001>
module attributes {stable_mosaic.version = 11 : i64} {
  func.func @_conv3x3_kernel(%arg0: i32, %arg1: i32, %arg2: memref<1x4x18x18xf32, #tpu.memory_space<vmem>>, %arg3: memref<144xf32, #tpu.memory_space<smem>>, %arg4: memref<4xf32, #tpu.memory_space<smem>>, %arg5: memref<1x1x16x16xf32, #tpu.memory_space<vmem>>) attributes {dimension_semantics = [#tpu.dimension_semantics<parallel>, #tpu.dimension_semantics<parallel>], iteration_bounds = array<i64: 2, 4>, scalar_prefetch = 0 : i64, scratch_operands = 0 : i64, tpu.core_type = #tpu.core_type<tc>, window_params = [{transform_indices = @transform_0, window_bounds = array<i64: 1, 4, 18, 18>}, {transform_indices = @transform_1, window_bounds = array<i64: 144>}, {transform_indices = @transform_2, window_bounds = array<i64: 4>}, {transform_indices = @transform_3, window_bounds = array<i64: 1, 1, 16, 16>}]} {
    %cst = arith.constant 0.000000e+00 : f32
    %0 = vector.broadcast %cst : f32 to vector<16x16xf32>
    %c4_i32 = arith.constant 4 : i32
    %1 = arith.muli %arg1, %c4_i32 : i32
    %c0_i32 = arith.constant 0 : i32
    %2 = arith.addi %1, %c0_i32 : i32
    %c9_i32 = arith.constant 9 : i32
    %3 = arith.muli %2, %c9_i32 : i32
    %c0_i32_0 = arith.constant 0 : i32
    %4 = arith.addi %3, %c0_i32_0 : i32
    %c0_i32_1 = arith.constant 0 : i32
    %5 = arith.addi %4, %c0_i32_1 : i32
    %6 = arith.index_cast %5 : i32 to index
    %7 = memref.load %arg3[%6] : memref<144xf32, #tpu.memory_space<smem>>
    %c0 = arith.constant 0 : index
    %c0_2 = arith.constant 0 : index
    %c0_3 = arith.constant 0 : index
    %c0_4 = arith.constant 0 : index
    %8 = vector.load %arg2[%c0, %c0_2, %c0_3, %c0_4] : memref<1x4x18x18xf32, #tpu.memory_space<vmem>>, vector<1x1x16x16xf32>
    %9 = vector.shape_cast %8 : vector<1x1x16x16xf32> to vector<16x16xf32>
    %10 = vector.broadcast %7 : f32 to vector<16x16xf32>
    %11 = arith.mulf %10, %9 : vector<16x16xf32>
    %12 = arith.addf %0, %11 : vector<16x16xf32>
    %c0_i32_5 = arith.constant 0 : i32
    %13 = arith.addi %3, %c0_i32_5 : i32
    %c1_i32 = arith.constant 1 : i32
    %14 = arith.addi %13, %c1_i32 : i32
    %15 = arith.index_cast %14 : i32 to index
    %16 = memref.load %arg3[%15] : memref<144xf32, #tpu.memory_space<smem>>
    %c0_6 = arith.constant 0 : index
    %c0_7 = arith.constant 0 : index
    %c0_8 = arith.constant 0 : index
    %c1 = arith.constant 1 : index
    %17 = vector.load %arg2[%c0_6, %c0_7, %c0_8, %c1] : memref<1x4x18x18xf32, #tpu.memory_space<vmem>>, vector<1x1x16x16xf32>
    %18 = vector.shape_cast %17 : vector<1x1x16x16xf32> to vector<16x16xf32>
    %19 = vector.broadcast %16 : f32 to vector<16x16xf32>
    %20 = arith.mulf %19, %18 : vector<16x16xf32>
    %21 = arith.addf %12, %20 : vector<16x16xf32>
    %c0_i32_9 = arith.constant 0 : i32
    %22 = arith.addi %3, %c0_i32_9 : i32
    %c2_i32 = arith.constant 2 : i32
    %23 = arith.addi %22, %c2_i32 : i32
    %24 = arith.index_cast %23 : i32 to index
    %25 = memref.load %arg3[%24] : memref<144xf32, #tpu.memory_space<smem>>
    %c0_10 = arith.constant 0 : index
    %c0_11 = arith.constant 0 : index
    %c0_12 = arith.constant 0 : index
    %c2 = arith.constant 2 : index
    %26 = vector.load %arg2[%c0_10, %c0_11, %c0_12, %c2] : memref<1x4x18x18xf32, #tpu.memory_space<vmem>>, vector<1x1x16x16xf32>
    %27 = vector.shape_cast %26 : vector<1x1x16x16xf32> to vector<16x16xf32>
    %28 = vector.broadcast %25 : f32 to vector<16x16xf32>
    %29 = arith.mulf %28, %27 : vector<16x16xf32>
    %30 = arith.addf %21, %29 : vector<16x16xf32>
    %c3_i32 = arith.constant 3 : i32
    %31 = arith.addi %3, %c3_i32 : i32
    %c0_i32_13 = arith.constant 0 : i32
    %32 = arith.addi %31, %c0_i32_13 : i32
    %33 = arith.index_cast %32 : i32 to index
    %34 = memref.load %arg3[%33] : memref<144xf32, #tpu.memory_space<smem>>
    %c0_14 = arith.constant 0 : index
    %c0_15 = arith.constant 0 : index
    %c1_16 = arith.constant 1 : index
    %c0_17 = arith.constant 0 : index
    %35 = vector.load %arg2[%c0_14, %c0_15, %c1_16, %c0_17] : memref<1x4x18x18xf32, #tpu.memory_space<vmem>>, vector<1x1x16x16xf32>
    %36 = vector.shape_cast %35 : vector<1x1x16x16xf32> to vector<16x16xf32>
    %37 = vector.broadcast %34 : f32 to vector<16x16xf32>
    %38 = arith.mulf %37, %36 : vector<16x16xf32>
    %39 = arith.addf %30, %38 : vector<16x16xf32>
    %c3_i32_18 = arith.constant 3 : i32
    %40 = arith.addi %3, %c3_i32_18 : i32
    %c1_i32_19 = arith.constant 1 : i32
    %41 = arith.addi %40, %c1_i32_19 : i32
    %42 = arith.index_cast %41 : i32 to index
    %43 = memref.load %arg3[%42] : memref<144xf32, #tpu.memory_space<smem>>
    %c0_20 = arith.constant 0 : index
    %c0_21 = arith.constant 0 : index
    %c1_22 = arith.constant 1 : index
    %c1_23 = arith.constant 1 : index
    %44 = vector.load %arg2[%c0_20, %c0_21, %c1_22, %c1_23] : memref<1x4x18x18xf32, #tpu.memory_space<vmem>>, vector<1x1x16x16xf32>
    %45 = vector.shape_cast %44 : vector<1x1x16x16xf32> to vector<16x16xf32>
    %46 = vector.broadcast %43 : f32 to vector<16x16xf32>
    %47 = arith.mulf %46, %45 : vector<16x16xf32>
    %48 = arith.addf %39, %47 : vector<16x16xf32>
    %c3_i32_24 = arith.constant 3 : i32
    %49 = arith.addi %3, %c3_i32_24 : i32
    %c2_i32_25 = arith.constant 2 : i32
    %50 = arith.addi %49, %c2_i32_25 : i32
    %51 = arith.index_cast %50 : i32 to index
    %52 = memref.load %arg3[%51] : memref<144xf32, #tpu.memory_space<smem>>
    %c0_26 = arith.constant 0 : index
    %c0_27 = arith.constant 0 : index
    %c1_28 = arith.constant 1 : index
    %c2_29 = arith.constant 2 : index
    %53 = vector.load %arg2[%c0_26, %c0_27, %c1_28, %c2_29] : memref<1x4x18x18xf32, #tpu.memory_space<vmem>>, vector<1x1x16x16xf32>
    %54 = vector.shape_cast %53 : vector<1x1x16x16xf32> to vector<16x16xf32>
    %55 = vector.broadcast %52 : f32 to vector<16x16xf32>
    %56 = arith.mulf %55, %54 : vector<16x16xf32>
    %57 = arith.addf %48, %56 : vector<16x16xf32>
    %c6_i32 = arith.constant 6 : i32
    %58 = arith.addi %3, %c6_i32 : i32
    %c0_i32_30 = arith.constant 0 : i32
    %59 = arith.addi %58, %c0_i32_30 : i32
    %60 = arith.index_cast %59 : i32 to index
    %61 = memref.load %arg3[%60] : memref<144xf32, #tpu.memory_space<smem>>
    %c0_31 = arith.constant 0 : index
    %c0_32 = arith.constant 0 : index
    %c2_33 = arith.constant 2 : index
    %c0_34 = arith.constant 0 : index
    %62 = vector.load %arg2[%c0_31, %c0_32, %c2_33, %c0_34] : memref<1x4x18x18xf32, #tpu.memory_space<vmem>>, vector<1x1x16x16xf32>
    %63 = vector.shape_cast %62 : vector<1x1x16x16xf32> to vector<16x16xf32>
    %64 = vector.broadcast %61 : f32 to vector<16x16xf32>
    %65 = arith.mulf %64, %63 : vector<16x16xf32>
    %66 = arith.addf %57, %65 : vector<16x16xf32>
    %c6_i32_35 = arith.constant 6 : i32
    %67 = arith.addi %3, %c6_i32_35 : i32
    %c1_i32_36 = arith.constant 1 : i32
    %68 = arith.addi %67, %c1_i32_36 : i32
    %69 = arith.index_cast %68 : i32 to index
    %70 = memref.load %arg3[%69] : memref<144xf32, #tpu.memory_space<smem>>
    %c0_37 = arith.constant 0 : index
    %c0_38 = arith.constant 0 : index
    %c2_39 = arith.constant 2 : index
    %c1_40 = arith.constant 1 : index
    %71 = vector.load %arg2[%c0_37, %c0_38, %c2_39, %c1_40] : memref<1x4x18x18xf32, #tpu.memory_space<vmem>>, vector<1x1x16x16xf32>
    %72 = vector.shape_cast %71 : vector<1x1x16x16xf32> to vector<16x16xf32>
    %73 = vector.broadcast %70 : f32 to vector<16x16xf32>
    %74 = arith.mulf %73, %72 : vector<16x16xf32>
    %75 = arith.addf %66, %74 : vector<16x16xf32>
    %c6_i32_41 = arith.constant 6 : i32
    %76 = arith.addi %3, %c6_i32_41 : i32
    %c2_i32_42 = arith.constant 2 : i32
    %77 = arith.addi %76, %c2_i32_42 : i32
    %78 = arith.index_cast %77 : i32 to index
    %79 = memref.load %arg3[%78] : memref<144xf32, #tpu.memory_space<smem>>
    %c0_43 = arith.constant 0 : index
    %c0_44 = arith.constant 0 : index
    %c2_45 = arith.constant 2 : index
    %c2_46 = arith.constant 2 : index
    %80 = vector.load %arg2[%c0_43, %c0_44, %c2_45, %c2_46] : memref<1x4x18x18xf32, #tpu.memory_space<vmem>>, vector<1x1x16x16xf32>
    %81 = vector.shape_cast %80 : vector<1x1x16x16xf32> to vector<16x16xf32>
    %82 = vector.broadcast %79 : f32 to vector<16x16xf32>
    %83 = arith.mulf %82, %81 : vector<16x16xf32>
    %84 = arith.addf %75, %83 : vector<16x16xf32>
    %c4_i32_47 = arith.constant 4 : i32
    %85 = arith.muli %arg1, %c4_i32_47 : i32
    %c1_i32_48 = arith.constant 1 : i32
    %86 = arith.addi %85, %c1_i32_48 : i32
    %c9_i32_49 = arith.constant 9 : i32
    %87 = arith.muli %86, %c9_i32_49 : i32
    %c0_i32_50 = arith.constant 0 : i32
    %88 = arith.addi %87, %c0_i32_50 : i32
    %c0_i32_51 = arith.constant 0 : i32
    %89 = arith.addi %88, %c0_i32_51 : i32
    %90 = arith.index_cast %89 : i32 to index
    %91 = memref.load %arg3[%90] : memref<144xf32, #tpu.memory_space<smem>>
    %c0_52 = arith.constant 0 : index
    %c1_53 = arith.constant 1 : index
    %c0_54 = arith.constant 0 : index
    %c0_55 = arith.constant 0 : index
    %92 = vector.load %arg2[%c0_52, %c1_53, %c0_54, %c0_55] : memref<1x4x18x18xf32, #tpu.memory_space<vmem>>, vector<1x1x16x16xf32>
    %93 = vector.shape_cast %92 : vector<1x1x16x16xf32> to vector<16x16xf32>
    %94 = vector.broadcast %91 : f32 to vector<16x16xf32>
    %95 = arith.mulf %94, %93 : vector<16x16xf32>
    %96 = arith.addf %84, %95 : vector<16x16xf32>
    %c0_i32_56 = arith.constant 0 : i32
    %97 = arith.addi %87, %c0_i32_56 : i32
    %c1_i32_57 = arith.constant 1 : i32
    %98 = arith.addi %97, %c1_i32_57 : i32
    %99 = arith.index_cast %98 : i32 to index
    %100 = memref.load %arg3[%99] : memref<144xf32, #tpu.memory_space<smem>>
    %c0_58 = arith.constant 0 : index
    %c1_59 = arith.constant 1 : index
    %c0_60 = arith.constant 0 : index
    %c1_61 = arith.constant 1 : index
    %101 = vector.load %arg2[%c0_58, %c1_59, %c0_60, %c1_61] : memref<1x4x18x18xf32, #tpu.memory_space<vmem>>, vector<1x1x16x16xf32>
    %102 = vector.shape_cast %101 : vector<1x1x16x16xf32> to vector<16x16xf32>
    %103 = vector.broadcast %100 : f32 to vector<16x16xf32>
    %104 = arith.mulf %103, %102 : vector<16x16xf32>
    %105 = arith.addf %96, %104 : vector<16x16xf32>
    %c0_i32_62 = arith.constant 0 : i32
    %106 = arith.addi %87, %c0_i32_62 : i32
    %c2_i32_63 = arith.constant 2 : i32
    %107 = arith.addi %106, %c2_i32_63 : i32
    %108 = arith.index_cast %107 : i32 to index
    %109 = memref.load %arg3[%108] : memref<144xf32, #tpu.memory_space<smem>>
    %c0_64 = arith.constant 0 : index
    %c1_65 = arith.constant 1 : index
    %c0_66 = arith.constant 0 : index
    %c2_67 = arith.constant 2 : index
    %110 = vector.load %arg2[%c0_64, %c1_65, %c0_66, %c2_67] : memref<1x4x18x18xf32, #tpu.memory_space<vmem>>, vector<1x1x16x16xf32>
    %111 = vector.shape_cast %110 : vector<1x1x16x16xf32> to vector<16x16xf32>
    %112 = vector.broadcast %109 : f32 to vector<16x16xf32>
    %113 = arith.mulf %112, %111 : vector<16x16xf32>
    %114 = arith.addf %105, %113 : vector<16x16xf32>
    %c3_i32_68 = arith.constant 3 : i32
    %115 = arith.addi %87, %c3_i32_68 : i32
    %c0_i32_69 = arith.constant 0 : i32
    %116 = arith.addi %115, %c0_i32_69 : i32
    %117 = arith.index_cast %116 : i32 to index
    %118 = memref.load %arg3[%117] : memref<144xf32, #tpu.memory_space<smem>>
    %c0_70 = arith.constant 0 : index
    %c1_71 = arith.constant 1 : index
    %c1_72 = arith.constant 1 : index
    %c0_73 = arith.constant 0 : index
    %119 = vector.load %arg2[%c0_70, %c1_71, %c1_72, %c0_73] : memref<1x4x18x18xf32, #tpu.memory_space<vmem>>, vector<1x1x16x16xf32>
    %120 = vector.shape_cast %119 : vector<1x1x16x16xf32> to vector<16x16xf32>
    %121 = vector.broadcast %118 : f32 to vector<16x16xf32>
    %122 = arith.mulf %121, %120 : vector<16x16xf32>
    %123 = arith.addf %114, %122 : vector<16x16xf32>
    %c3_i32_74 = arith.constant 3 : i32
    %124 = arith.addi %87, %c3_i32_74 : i32
    %c1_i32_75 = arith.constant 1 : i32
    %125 = arith.addi %124, %c1_i32_75 : i32
    %126 = arith.index_cast %125 : i32 to index
    %127 = memref.load %arg3[%126] : memref<144xf32, #tpu.memory_space<smem>>
    %c0_76 = arith.constant 0 : index
    %c1_77 = arith.constant 1 : index
    %c1_78 = arith.constant 1 : index
    %c1_79 = arith.constant 1 : index
    %128 = vector.load %arg2[%c0_76, %c1_77, %c1_78, %c1_79] : memref<1x4x18x18xf32, #tpu.memory_space<vmem>>, vector<1x1x16x16xf32>
    %129 = vector.shape_cast %128 : vector<1x1x16x16xf32> to vector<16x16xf32>
    %130 = vector.broadcast %127 : f32 to vector<16x16xf32>
    %131 = arith.mulf %130, %129 : vector<16x16xf32>
    %132 = arith.addf %123, %131 : vector<16x16xf32>
    %c3_i32_80 = arith.constant 3 : i32
    %133 = arith.addi %87, %c3_i32_80 : i32
    %c2_i32_81 = arith.constant 2 : i32
    %134 = arith.addi %133, %c2_i32_81 : i32
    %135 = arith.index_cast %134 : i32 to index
    %136 = memref.load %arg3[%135] : memref<144xf32, #tpu.memory_space<smem>>
    %c0_82 = arith.constant 0 : index
    %c1_83 = arith.constant 1 : index
    %c1_84 = arith.constant 1 : index
    %c2_85 = arith.constant 2 : index
    %137 = vector.load %arg2[%c0_82, %c1_83, %c1_84, %c2_85] : memref<1x4x18x18xf32, #tpu.memory_space<vmem>>, vector<1x1x16x16xf32>
    %138 = vector.shape_cast %137 : vector<1x1x16x16xf32> to vector<16x16xf32>
    %139 = vector.broadcast %136 : f32 to vector<16x16xf32>
    %140 = arith.mulf %139, %138 : vector<16x16xf32>
    %141 = arith.addf %132, %140 : vector<16x16xf32>
    %c6_i32_86 = arith.constant 6 : i32
    %142 = arith.addi %87, %c6_i32_86 : i32
    %c0_i32_87 = arith.constant 0 : i32
    %143 = arith.addi %142, %c0_i32_87 : i32
    %144 = arith.index_cast %143 : i32 to index
    %145 = memref.load %arg3[%144] : memref<144xf32, #tpu.memory_space<smem>>
    %c0_88 = arith.constant 0 : index
    %c1_89 = arith.constant 1 : index
    %c2_90 = arith.constant 2 : index
    %c0_91 = arith.constant 0 : index
    %146 = vector.load %arg2[%c0_88, %c1_89, %c2_90, %c0_91] : memref<1x4x18x18xf32, #tpu.memory_space<vmem>>, vector<1x1x16x16xf32>
    %147 = vector.shape_cast %146 : vector<1x1x16x16xf32> to vector<16x16xf32>
    %148 = vector.broadcast %145 : f32 to vector<16x16xf32>
    %149 = arith.mulf %148, %147 : vector<16x16xf32>
    %150 = arith.addf %141, %149 : vector<16x16xf32>
    %c6_i32_92 = arith.constant 6 : i32
    %151 = arith.addi %87, %c6_i32_92 : i32
    %c1_i32_93 = arith.constant 1 : i32
    %152 = arith.addi %151, %c1_i32_93 : i32
    %153 = arith.index_cast %152 : i32 to index
    %154 = memref.load %arg3[%153] : memref<144xf32, #tpu.memory_space<smem>>
    %c0_94 = arith.constant 0 : index
    %c1_95 = arith.constant 1 : index
    %c2_96 = arith.constant 2 : index
    %c1_97 = arith.constant 1 : index
    %155 = vector.load %arg2[%c0_94, %c1_95, %c2_96, %c1_97] : memref<1x4x18x18xf32, #tpu.memory_space<vmem>>, vector<1x1x16x16xf32>
    %156 = vector.shape_cast %155 : vector<1x1x16x16xf32> to vector<16x16xf32>
    %157 = vector.broadcast %154 : f32 to vector<16x16xf32>
    %158 = arith.mulf %157, %156 : vector<16x16xf32>
    %159 = arith.addf %150, %158 : vector<16x16xf32>
    %c6_i32_98 = arith.constant 6 : i32
    %160 = arith.addi %87, %c6_i32_98 : i32
    %c2_i32_99 = arith.constant 2 : i32
    %161 = arith.addi %160, %c2_i32_99 : i32
    %162 = arith.index_cast %161 : i32 to index
    %163 = memref.load %arg3[%162] : memref<144xf32, #tpu.memory_space<smem>>
    %c0_100 = arith.constant 0 : index
    %c1_101 = arith.constant 1 : index
    %c2_102 = arith.constant 2 : index
    %c2_103 = arith.constant 2 : index
    %164 = vector.load %arg2[%c0_100, %c1_101, %c2_102, %c2_103] : memref<1x4x18x18xf32, #tpu.memory_space<vmem>>, vector<1x1x16x16xf32>
    %165 = vector.shape_cast %164 : vector<1x1x16x16xf32> to vector<16x16xf32>
    %166 = vector.broadcast %163 : f32 to vector<16x16xf32>
    %167 = arith.mulf %166, %165 : vector<16x16xf32>
    %168 = arith.addf %159, %167 : vector<16x16xf32>
    %c4_i32_104 = arith.constant 4 : i32
    %169 = arith.muli %arg1, %c4_i32_104 : i32
    %c2_i32_105 = arith.constant 2 : i32
    %170 = arith.addi %169, %c2_i32_105 : i32
    %c9_i32_106 = arith.constant 9 : i32
    %171 = arith.muli %170, %c9_i32_106 : i32
    %c0_i32_107 = arith.constant 0 : i32
    %172 = arith.addi %171, %c0_i32_107 : i32
    %c0_i32_108 = arith.constant 0 : i32
    %173 = arith.addi %172, %c0_i32_108 : i32
    %174 = arith.index_cast %173 : i32 to index
    %175 = memref.load %arg3[%174] : memref<144xf32, #tpu.memory_space<smem>>
    %c0_109 = arith.constant 0 : index
    %c2_110 = arith.constant 2 : index
    %c0_111 = arith.constant 0 : index
    %c0_112 = arith.constant 0 : index
    %176 = vector.load %arg2[%c0_109, %c2_110, %c0_111, %c0_112] : memref<1x4x18x18xf32, #tpu.memory_space<vmem>>, vector<1x1x16x16xf32>
    %177 = vector.shape_cast %176 : vector<1x1x16x16xf32> to vector<16x16xf32>
    %178 = vector.broadcast %175 : f32 to vector<16x16xf32>
    %179 = arith.mulf %178, %177 : vector<16x16xf32>
    %180 = arith.addf %168, %179 : vector<16x16xf32>
    %c0_i32_113 = arith.constant 0 : i32
    %181 = arith.addi %171, %c0_i32_113 : i32
    %c1_i32_114 = arith.constant 1 : i32
    %182 = arith.addi %181, %c1_i32_114 : i32
    %183 = arith.index_cast %182 : i32 to index
    %184 = memref.load %arg3[%183] : memref<144xf32, #tpu.memory_space<smem>>
    %c0_115 = arith.constant 0 : index
    %c2_116 = arith.constant 2 : index
    %c0_117 = arith.constant 0 : index
    %c1_118 = arith.constant 1 : index
    %185 = vector.load %arg2[%c0_115, %c2_116, %c0_117, %c1_118] : memref<1x4x18x18xf32, #tpu.memory_space<vmem>>, vector<1x1x16x16xf32>
    %186 = vector.shape_cast %185 : vector<1x1x16x16xf32> to vector<16x16xf32>
    %187 = vector.broadcast %184 : f32 to vector<16x16xf32>
    %188 = arith.mulf %187, %186 : vector<16x16xf32>
    %189 = arith.addf %180, %188 : vector<16x16xf32>
    %c0_i32_119 = arith.constant 0 : i32
    %190 = arith.addi %171, %c0_i32_119 : i32
    %c2_i32_120 = arith.constant 2 : i32
    %191 = arith.addi %190, %c2_i32_120 : i32
    %192 = arith.index_cast %191 : i32 to index
    %193 = memref.load %arg3[%192] : memref<144xf32, #tpu.memory_space<smem>>
    %c0_121 = arith.constant 0 : index
    %c2_122 = arith.constant 2 : index
    %c0_123 = arith.constant 0 : index
    %c2_124 = arith.constant 2 : index
    %194 = vector.load %arg2[%c0_121, %c2_122, %c0_123, %c2_124] : memref<1x4x18x18xf32, #tpu.memory_space<vmem>>, vector<1x1x16x16xf32>
    %195 = vector.shape_cast %194 : vector<1x1x16x16xf32> to vector<16x16xf32>
    %196 = vector.broadcast %193 : f32 to vector<16x16xf32>
    %197 = arith.mulf %196, %195 : vector<16x16xf32>
    %198 = arith.addf %189, %197 : vector<16x16xf32>
    %c3_i32_125 = arith.constant 3 : i32
    %199 = arith.addi %171, %c3_i32_125 : i32
    %c0_i32_126 = arith.constant 0 : i32
    %200 = arith.addi %199, %c0_i32_126 : i32
    %201 = arith.index_cast %200 : i32 to index
    %202 = memref.load %arg3[%201] : memref<144xf32, #tpu.memory_space<smem>>
    %c0_127 = arith.constant 0 : index
    %c2_128 = arith.constant 2 : index
    %c1_129 = arith.constant 1 : index
    %c0_130 = arith.constant 0 : index
    %203 = vector.load %arg2[%c0_127, %c2_128, %c1_129, %c0_130] : memref<1x4x18x18xf32, #tpu.memory_space<vmem>>, vector<1x1x16x16xf32>
    %204 = vector.shape_cast %203 : vector<1x1x16x16xf32> to vector<16x16xf32>
    %205 = vector.broadcast %202 : f32 to vector<16x16xf32>
    %206 = arith.mulf %205, %204 : vector<16x16xf32>
    %207 = arith.addf %198, %206 : vector<16x16xf32>
    %c3_i32_131 = arith.constant 3 : i32
    %208 = arith.addi %171, %c3_i32_131 : i32
    %c1_i32_132 = arith.constant 1 : i32
    %209 = arith.addi %208, %c1_i32_132 : i32
    %210 = arith.index_cast %209 : i32 to index
    %211 = memref.load %arg3[%210] : memref<144xf32, #tpu.memory_space<smem>>
    %c0_133 = arith.constant 0 : index
    %c2_134 = arith.constant 2 : index
    %c1_135 = arith.constant 1 : index
    %c1_136 = arith.constant 1 : index
    %212 = vector.load %arg2[%c0_133, %c2_134, %c1_135, %c1_136] : memref<1x4x18x18xf32, #tpu.memory_space<vmem>>, vector<1x1x16x16xf32>
    %213 = vector.shape_cast %212 : vector<1x1x16x16xf32> to vector<16x16xf32>
    %214 = vector.broadcast %211 : f32 to vector<16x16xf32>
    %215 = arith.mulf %214, %213 : vector<16x16xf32>
    %216 = arith.addf %207, %215 : vector<16x16xf32>
    %c3_i32_137 = arith.constant 3 : i32
    %217 = arith.addi %171, %c3_i32_137 : i32
    %c2_i32_138 = arith.constant 2 : i32
    %218 = arith.addi %217, %c2_i32_138 : i32
    %219 = arith.index_cast %218 : i32 to index
    %220 = memref.load %arg3[%219] : memref<144xf32, #tpu.memory_space<smem>>
    %c0_139 = arith.constant 0 : index
    %c2_140 = arith.constant 2 : index
    %c1_141 = arith.constant 1 : index
    %c2_142 = arith.constant 2 : index
    %221 = vector.load %arg2[%c0_139, %c2_140, %c1_141, %c2_142] : memref<1x4x18x18xf32, #tpu.memory_space<vmem>>, vector<1x1x16x16xf32>
    %222 = vector.shape_cast %221 : vector<1x1x16x16xf32> to vector<16x16xf32>
    %223 = vector.broadcast %220 : f32 to vector<16x16xf32>
    %224 = arith.mulf %223, %222 : vector<16x16xf32>
    %225 = arith.addf %216, %224 : vector<16x16xf32>
    %c6_i32_143 = arith.constant 6 : i32
    %226 = arith.addi %171, %c6_i32_143 : i32
    %c0_i32_144 = arith.constant 0 : i32
    %227 = arith.addi %226, %c0_i32_144 : i32
    %228 = arith.index_cast %227 : i32 to index
    %229 = memref.load %arg3[%228] : memref<144xf32, #tpu.memory_space<smem>>
    %c0_145 = arith.constant 0 : index
    %c2_146 = arith.constant 2 : index
    %c2_147 = arith.constant 2 : index
    %c0_148 = arith.constant 0 : index
    %230 = vector.load %arg2[%c0_145, %c2_146, %c2_147, %c0_148] : memref<1x4x18x18xf32, #tpu.memory_space<vmem>>, vector<1x1x16x16xf32>
    %231 = vector.shape_cast %230 : vector<1x1x16x16xf32> to vector<16x16xf32>
    %232 = vector.broadcast %229 : f32 to vector<16x16xf32>
    %233 = arith.mulf %232, %231 : vector<16x16xf32>
    %234 = arith.addf %225, %233 : vector<16x16xf32>
    %c6_i32_149 = arith.constant 6 : i32
    %235 = arith.addi %171, %c6_i32_149 : i32
    %c1_i32_150 = arith.constant 1 : i32
    %236 = arith.addi %235, %c1_i32_150 : i32
    %237 = arith.index_cast %236 : i32 to index
    %238 = memref.load %arg3[%237] : memref<144xf32, #tpu.memory_space<smem>>
    %c0_151 = arith.constant 0 : index
    %c2_152 = arith.constant 2 : index
    %c2_153 = arith.constant 2 : index
    %c1_154 = arith.constant 1 : index
    %239 = vector.load %arg2[%c0_151, %c2_152, %c2_153, %c1_154] : memref<1x4x18x18xf32, #tpu.memory_space<vmem>>, vector<1x1x16x16xf32>
    %240 = vector.shape_cast %239 : vector<1x1x16x16xf32> to vector<16x16xf32>
    %241 = vector.broadcast %238 : f32 to vector<16x16xf32>
    %242 = arith.mulf %241, %240 : vector<16x16xf32>
    %243 = arith.addf %234, %242 : vector<16x16xf32>
    %c6_i32_155 = arith.constant 6 : i32
    %244 = arith.addi %171, %c6_i32_155 : i32
    %c2_i32_156 = arith.constant 2 : i32
    %245 = arith.addi %244, %c2_i32_156 : i32
    %246 = arith.index_cast %245 : i32 to index
    %247 = memref.load %arg3[%246] : memref<144xf32, #tpu.memory_space<smem>>
    %c0_157 = arith.constant 0 : index
    %c2_158 = arith.constant 2 : index
    %c2_159 = arith.constant 2 : index
    %c2_160 = arith.constant 2 : index
    %248 = vector.load %arg2[%c0_157, %c2_158, %c2_159, %c2_160] : memref<1x4x18x18xf32, #tpu.memory_space<vmem>>, vector<1x1x16x16xf32>
    %249 = vector.shape_cast %248 : vector<1x1x16x16xf32> to vector<16x16xf32>
    %250 = vector.broadcast %247 : f32 to vector<16x16xf32>
    %251 = arith.mulf %250, %249 : vector<16x16xf32>
    %252 = arith.addf %243, %251 : vector<16x16xf32>
    %c4_i32_161 = arith.constant 4 : i32
    %253 = arith.muli %arg1, %c4_i32_161 : i32
    %c3_i32_162 = arith.constant 3 : i32
    %254 = arith.addi %253, %c3_i32_162 : i32
    %c9_i32_163 = arith.constant 9 : i32
    %255 = arith.muli %254, %c9_i32_163 : i32
    %c0_i32_164 = arith.constant 0 : i32
    %256 = arith.addi %255, %c0_i32_164 : i32
    %c0_i32_165 = arith.constant 0 : i32
    %257 = arith.addi %256, %c0_i32_165 : i32
    %258 = arith.index_cast %257 : i32 to index
    %259 = memref.load %arg3[%258] : memref<144xf32, #tpu.memory_space<smem>>
    %c0_166 = arith.constant 0 : index
    %c3 = arith.constant 3 : index
    %c0_167 = arith.constant 0 : index
    %c0_168 = arith.constant 0 : index
    %260 = vector.load %arg2[%c0_166, %c3, %c0_167, %c0_168] : memref<1x4x18x18xf32, #tpu.memory_space<vmem>>, vector<1x1x16x16xf32>
    %261 = vector.shape_cast %260 : vector<1x1x16x16xf32> to vector<16x16xf32>
    %262 = vector.broadcast %259 : f32 to vector<16x16xf32>
    %263 = arith.mulf %262, %261 : vector<16x16xf32>
    %264 = arith.addf %252, %263 : vector<16x16xf32>
    %c0_i32_169 = arith.constant 0 : i32
    %265 = arith.addi %255, %c0_i32_169 : i32
    %c1_i32_170 = arith.constant 1 : i32
    %266 = arith.addi %265, %c1_i32_170 : i32
    %267 = arith.index_cast %266 : i32 to index
    %268 = memref.load %arg3[%267] : memref<144xf32, #tpu.memory_space<smem>>
    %c0_171 = arith.constant 0 : index
    %c3_172 = arith.constant 3 : index
    %c0_173 = arith.constant 0 : index
    %c1_174 = arith.constant 1 : index
    %269 = vector.load %arg2[%c0_171, %c3_172, %c0_173, %c1_174] : memref<1x4x18x18xf32, #tpu.memory_space<vmem>>, vector<1x1x16x16xf32>
    %270 = vector.shape_cast %269 : vector<1x1x16x16xf32> to vector<16x16xf32>
    %271 = vector.broadcast %268 : f32 to vector<16x16xf32>
    %272 = arith.mulf %271, %270 : vector<16x16xf32>
    %273 = arith.addf %264, %272 : vector<16x16xf32>
    %c0_i32_175 = arith.constant 0 : i32
    %274 = arith.addi %255, %c0_i32_175 : i32
    %c2_i32_176 = arith.constant 2 : i32
    %275 = arith.addi %274, %c2_i32_176 : i32
    %276 = arith.index_cast %275 : i32 to index
    %277 = memref.load %arg3[%276] : memref<144xf32, #tpu.memory_space<smem>>
    %c0_177 = arith.constant 0 : index
    %c3_178 = arith.constant 3 : index
    %c0_179 = arith.constant 0 : index
    %c2_180 = arith.constant 2 : index
    %278 = vector.load %arg2[%c0_177, %c3_178, %c0_179, %c2_180] : memref<1x4x18x18xf32, #tpu.memory_space<vmem>>, vector<1x1x16x16xf32>
    %279 = vector.shape_cast %278 : vector<1x1x16x16xf32> to vector<16x16xf32>
    %280 = vector.broadcast %277 : f32 to vector<16x16xf32>
    %281 = arith.mulf %280, %279 : vector<16x16xf32>
    %282 = arith.addf %273, %281 : vector<16x16xf32>
    %c3_i32_181 = arith.constant 3 : i32
    %283 = arith.addi %255, %c3_i32_181 : i32
    %c0_i32_182 = arith.constant 0 : i32
    %284 = arith.addi %283, %c0_i32_182 : i32
    %285 = arith.index_cast %284 : i32 to index
    %286 = memref.load %arg3[%285] : memref<144xf32, #tpu.memory_space<smem>>
    %c0_183 = arith.constant 0 : index
    %c3_184 = arith.constant 3 : index
    %c1_185 = arith.constant 1 : index
    %c0_186 = arith.constant 0 : index
    %287 = vector.load %arg2[%c0_183, %c3_184, %c1_185, %c0_186] : memref<1x4x18x18xf32, #tpu.memory_space<vmem>>, vector<1x1x16x16xf32>
    %288 = vector.shape_cast %287 : vector<1x1x16x16xf32> to vector<16x16xf32>
    %289 = vector.broadcast %286 : f32 to vector<16x16xf32>
    %290 = arith.mulf %289, %288 : vector<16x16xf32>
    %291 = arith.addf %282, %290 : vector<16x16xf32>
    %c3_i32_187 = arith.constant 3 : i32
    %292 = arith.addi %255, %c3_i32_187 : i32
    %c1_i32_188 = arith.constant 1 : i32
    %293 = arith.addi %292, %c1_i32_188 : i32
    %294 = arith.index_cast %293 : i32 to index
    %295 = memref.load %arg3[%294] : memref<144xf32, #tpu.memory_space<smem>>
    %c0_189 = arith.constant 0 : index
    %c3_190 = arith.constant 3 : index
    %c1_191 = arith.constant 1 : index
    %c1_192 = arith.constant 1 : index
    %296 = vector.load %arg2[%c0_189, %c3_190, %c1_191, %c1_192] : memref<1x4x18x18xf32, #tpu.memory_space<vmem>>, vector<1x1x16x16xf32>
    %297 = vector.shape_cast %296 : vector<1x1x16x16xf32> to vector<16x16xf32>
    %298 = vector.broadcast %295 : f32 to vector<16x16xf32>
    %299 = arith.mulf %298, %297 : vector<16x16xf32>
    %300 = arith.addf %291, %299 : vector<16x16xf32>
    %c3_i32_193 = arith.constant 3 : i32
    %301 = arith.addi %255, %c3_i32_193 : i32
    %c2_i32_194 = arith.constant 2 : i32
    %302 = arith.addi %301, %c2_i32_194 : i32
    %303 = arith.index_cast %302 : i32 to index
    %304 = memref.load %arg3[%303] : memref<144xf32, #tpu.memory_space<smem>>
    %c0_195 = arith.constant 0 : index
    %c3_196 = arith.constant 3 : index
    %c1_197 = arith.constant 1 : index
    %c2_198 = arith.constant 2 : index
    %305 = vector.load %arg2[%c0_195, %c3_196, %c1_197, %c2_198] : memref<1x4x18x18xf32, #tpu.memory_space<vmem>>, vector<1x1x16x16xf32>
    %306 = vector.shape_cast %305 : vector<1x1x16x16xf32> to vector<16x16xf32>
    %307 = vector.broadcast %304 : f32 to vector<16x16xf32>
    %308 = arith.mulf %307, %306 : vector<16x16xf32>
    %309 = arith.addf %300, %308 : vector<16x16xf32>
    %c6_i32_199 = arith.constant 6 : i32
    %310 = arith.addi %255, %c6_i32_199 : i32
    %c0_i32_200 = arith.constant 0 : i32
    %311 = arith.addi %310, %c0_i32_200 : i32
    %312 = arith.index_cast %311 : i32 to index
    %313 = memref.load %arg3[%312] : memref<144xf32, #tpu.memory_space<smem>>
    %c0_201 = arith.constant 0 : index
    %c3_202 = arith.constant 3 : index
    %c2_203 = arith.constant 2 : index
    %c0_204 = arith.constant 0 : index
    %314 = vector.load %arg2[%c0_201, %c3_202, %c2_203, %c0_204] : memref<1x4x18x18xf32, #tpu.memory_space<vmem>>, vector<1x1x16x16xf32>
    %315 = vector.shape_cast %314 : vector<1x1x16x16xf32> to vector<16x16xf32>
    %316 = vector.broadcast %313 : f32 to vector<16x16xf32>
    %317 = arith.mulf %316, %315 : vector<16x16xf32>
    %318 = arith.addf %309, %317 : vector<16x16xf32>
    %c6_i32_205 = arith.constant 6 : i32
    %319 = arith.addi %255, %c6_i32_205 : i32
    %c1_i32_206 = arith.constant 1 : i32
    %320 = arith.addi %319, %c1_i32_206 : i32
    %321 = arith.index_cast %320 : i32 to index
    %322 = memref.load %arg3[%321] : memref<144xf32, #tpu.memory_space<smem>>
    %c0_207 = arith.constant 0 : index
    %c3_208 = arith.constant 3 : index
    %c2_209 = arith.constant 2 : index
    %c1_210 = arith.constant 1 : index
    %323 = vector.load %arg2[%c0_207, %c3_208, %c2_209, %c1_210] : memref<1x4x18x18xf32, #tpu.memory_space<vmem>>, vector<1x1x16x16xf32>
    %324 = vector.shape_cast %323 : vector<1x1x16x16xf32> to vector<16x16xf32>
    %325 = vector.broadcast %322 : f32 to vector<16x16xf32>
    %326 = arith.mulf %325, %324 : vector<16x16xf32>
    %327 = arith.addf %318, %326 : vector<16x16xf32>
    %c6_i32_211 = arith.constant 6 : i32
    %328 = arith.addi %255, %c6_i32_211 : i32
    %c2_i32_212 = arith.constant 2 : i32
    %329 = arith.addi %328, %c2_i32_212 : i32
    %330 = arith.index_cast %329 : i32 to index
    %331 = memref.load %arg3[%330] : memref<144xf32, #tpu.memory_space<smem>>
    %c0_213 = arith.constant 0 : index
    %c3_214 = arith.constant 3 : index
    %c2_215 = arith.constant 2 : index
    %c2_216 = arith.constant 2 : index
    %332 = vector.load %arg2[%c0_213, %c3_214, %c2_215, %c2_216] : memref<1x4x18x18xf32, #tpu.memory_space<vmem>>, vector<1x1x16x16xf32>
    %333 = vector.shape_cast %332 : vector<1x1x16x16xf32> to vector<16x16xf32>
    %334 = vector.broadcast %331 : f32 to vector<16x16xf32>
    %335 = arith.mulf %334, %333 : vector<16x16xf32>
    %336 = arith.addf %327, %335 : vector<16x16xf32>
    %337 = arith.index_cast %arg1 : i32 to index
    %338 = memref.load %arg4[%337] : memref<4xf32, #tpu.memory_space<smem>>
    %339 = vector.broadcast %338 : f32 to vector<16x16xf32>
    %340 = arith.addf %336, %339 : vector<16x16xf32>
    %c0_217 = arith.constant 0 : index
    %c0_218 = arith.constant 0 : index
    %c0_219 = arith.constant 0 : index
    %c0_220 = arith.constant 0 : index
    %341 = vector.load %arg5[%c0_217, %c0_218, %c0_219, %c0_220] : memref<1x1x16x16xf32, #tpu.memory_space<vmem>>, vector<1x1x16x16xf32>
    %342 = vector.shape_cast %341 : vector<1x1x16x16xf32> to vector<16x16xf32>
    %343 = vector.shape_cast %340 : vector<16x16xf32> to vector<1x1x16x16xf32>
    tpu.vector_store %arg5[%c0_217, %c0_218, %c0_219, %c0_220], %343 {strides = array<i32>} : memref<1x1x16x16xf32, #tpu.memory_space<vmem>>, vector<1x1x16x16xf32>,
    return
  }
  func.func @transform_0(%arg0: i32, %arg1: i32) -> (i32, i32, i32, i32) {
    %c0_i32 = arith.constant 0 : i32
    %c0_i32_0 = arith.constant 0 : i32
    %c0_i32_1 = arith.constant 0 : i32
    %c0_i32_2 = arith.constant 0 : i32
    return %arg0, %c0_i32, %c0_i32_0, %c0_i32_1 : i32, i32, i32, i32
  }
  func.func @transform_1(%arg0: i32, %arg1: i32) -> i32 {
    %c0_i32 = arith.constant 0 : i32
    %c0_i32_0 = arith.constant 0 : i32
    return %c0_i32 : i32
  }
  func.func @transform_2(%arg0: i32, %arg1: i32) -> i32 {
    %c0_i32 = arith.constant 0 : i32
    %c0_i32_0 = arith.constant 0 : i32
    return %c0_i32 : i32
  }
  func.func @transform_3(%arg0: i32, %arg1: i32) -> (i32, i32, i32, i32) {
    %c0_i32 = arith.constant 0 : i32
    %c0_i32_0 = arith.constant 0 : i32
    %c0_i32_1 = arith.constant 0 : i32
    return %arg0, %arg1, %c0_i32, %c0_i32_0 : i32, i32, i32, i32
  }
}

</mosaic_0001>

<bundles_post_ra>
// kernel: tpu_custom_call.1
= control target key start
LH: loop header
LB: loop body
LE: loop exit
PB: predicated region body
PF: predicated region fallthrough
CT: control target
= control target key end

     0   :  { %s1551_s0 = inlined_call_operand.vmem [shape: f32[2,4,18,18], index: 0, kind: input, shape index: {}]   ;;  %s1552_s1 = inlined_call_operand.vmem [shape: f32[144], index: 1, kind: input, shape index: {}]   ;;  %s1553_s2 = inlined_call_operand.vmem [shape: f32[4], index: 2, kind: input, shape index: {}]   ;;  %s1554_s3 = inlined_call_operand.hbm [shape: f32[2,4,16,16], index: 3, kind: output, shape index: {}]  }
   0x1   :  { %1566 = sst [smem:[#allocation14_spill]] %s1551_s0 }
   0x2   :  { %1567 = sst [smem:[#allocation15_spill]] %s1552_s1 }
   0x3   :  { %1568 = sst [smem:[#allocation16_spill]] %s1553_s2 }
   0x4   :  { %8 = vsyncpa [#allocation4], 0 }
   0x5   :  { %9 = vsyncpa [#allocation6], 0 }
   0x6   :  { %10 = vsyncpa [#allocation3], 0 }
   0x7   :  { %12 = vsyncpa [#allocation3 + $0x1], 0  ;;  %s1098_s12 = smov 0   ;;  %s1100_s13 = smov 0  }
   0x8   :  { %s1102_s14 = smov 0   ;;  %s1104_s15 = smov 0  }
   0x9   :  { %s1106_s16 = smov 0   ;;  %s1108_s17 = smov 0  }
   0xa   :  { %s1110_s18 = smov 0   ;;  %s1112_s19 = smov 0  }
   0xb LB: > { %1569 = sst [smem:[#allocation11_spill]] %s1065_s18  ;;  %s806_s20 = sadd.s32 4294967295, %s1069_s19   ;;  %s1069_s19 = sphi %s1112_s19, %s18_s19   ;;  %s1065_s18 = sphi %s1110_s18, %s1588_s18   ;;  %s1061_s17 = sphi %s1108_s17, %s1593_s17   ;;  %s1057_s16 = sphi %s1106_s16, %s1586_s16   ;;  %s1053_s15 = sphi %s1104_s15, %s1592_s15   ;;  %s1049_s14 = sphi %s1102_s14, %s1591_s14   ;;  %s1045_s13 = sphi %s1100_s13, %s1590_s13   ;;  %s1041_s12 = sphi %s1098_s12, %s1589_s12  }
   0xc   : > { %s807_s21 = sadd.s32 4294967294, %s1069_s19   ;;  %s27_s22 = sadd.s32 1, %s1061_s17 }
   0xd   : > { %s30_s23 = sadd.s32 1, %s1065_s18  ;;  %p28_p0 = scmp.ge.s32.totalorder %s27_s22, 4 }
   0xe   : > { %s107_s24 = sadd.s32 1, %s1049_s14  ;;  %p117_p1 = scmp.ne.s32.totalorder %s1049_s14, %s1045_s13 }
   0xf   : > { %p118_p2 = scmp.eq.s32.totalorder %s806_s20, 7  ;;  %s1595_s22 = smov (%p28_p0, %s27_s22), 0 }
  0x10   : > { %1570 = sst [smem:[#allocation12_spill]] %s1595_s22  ;;  %s1597_s23 = smov (!%p28_p0, %s30_s23), %s1065_s18 }
  0x11   : > { %s103_s25 = ssub.s32 %s1061_s17, %s1595_s22  ;;  %p1150_p3 = por %p118_p2, %p117_p1 }
  0x12   : > { %p32_p4 = scmp.ge.s32.totalorder %s1597_s23, 2  ;;  %p123_p5 = scmp.ne.s32.totalorder %s1045_s13, %s1041_s12 }
  0x13   : > { %s1571_s26 = scalar_select %p1150_p3, 1, 0 }
  0x14   : > { %p124_p6 = scmp.eq.s32.totalorder %s807_s21, 7  ;;  %p808_p7 = scmp.ge.s32.totalorder %s1069_s19, 1 }
  0x15   : > { %s1599_s23 = smov (%p32_p4, %s1597_s23), 0  ;;  %p131_p9 = scmp.lt.s32.totalorder %s1069_s19, 9 }
  0x16   : > { %1572 = sst [smem:[#allocation13_spill]] %s1599_s23  ;;  %p1159_p8 = por %p124_p6, %p123_p5 }
  0x17   : > { %s102_s28 = ssub.s32 %s1065_s18, %s1599_s23  ;;  %p1166_p10 = pnand %p808_p7, %p131_p9 }
  0x18   : > { %s1573_s27 = scalar_select %p1159_p8, 1, 0 }
  0x19   : > { %s104_s29 = sor.u32 %s103_s25, %s102_s28  ;;  %p1170_p12 = scmp.eq.s32.totalorder %s806_s20, 0 }
  0x1a   : > { %s1574_s30 = scalar_select %p1166_p10, 1, 0 }
  0x1b   : > { %p105_p11 = scmp.eq.s32.totalorder %s104_s29, 0  ;;  %p853_p13 = pneg %p1166_p10 }
  0x1c   : > { %s1575_s4 = scalar_select %p1170_p12, 1, 0 }
  0x1d   : > { %s1576_s1 = sld [smem:[#allocation15_spill]]  ;;  %p1184_p0 = pnand %p1170_p12, %p853_p13 }
  0x1e   : > { %s1180_s8 = scalar_select %p105_p11, %s1049_s14, %s107_s24  }
  0x1f   : > { %s1578_s2 = sld [smem:[#allocation16_spill]]  ;;  %p941_p2 = pneg %p1184_p0 }
  0x23   : > { %s144_s7 = sshll.u32 %s1576_s1, 4  ;;  %s145_s7 = int_to_ptr.vmem [resolvable:$true] %s144_s7 }
  0x24   : > { %s939_s21 = scalar_lea.vmem %s145_s7, 32  ;;  %p947_p6 = scmp.lt.s32.totalorder %s145_s7, %s145_s7 }
  0x25   : > { %s155_s20 = sshll.u32 %s1578_s2, 4  ;;  %p940_p1 = scmp.ne.s32.totalorder %s145_s7, %s939_s21  ;;  %s156_s20 = int_to_ptr.vmem [resolvable:$true] %s155_s20 }
  0x26   : > { %p948_p7 = scmp.lt.s32.totalorder %s939_s21, %s939_s21 }
  0x27   : > { %p942_p4 = pnand %p941_p2, %p940_p1 }
  0x28   : > { %p949_p9 = por %p948_p7, %p947_p6 }
  0x29   : > { %p943_p5 = pneg %p942_p4 }
  0x2b   : > { %p950_p11 = pnand %p949_p9, %p943_p5 }
  0x2d   : > { %953 = shalt.err (!%p950_p11)
}
  0x2e   : > { %s1071_s24 = smov [#allocation2]   ;;  %s954_s25 = scalar_lea.vmem %s156_s20, 16 }
  0x2f   : > { %856 = dma.vmem_to_smem (!%p1184_p0), %s145_s7, 32, %s1071_s24, [#allocation4]  }
  0x30   : > { %p955_p13 = scmp.ne.s32.totalorder %s156_s20, %s954_s25  ;;  %p962_p12 = scmp.lt.s32.totalorder %s156_s20, %s156_s20 }
  0x31   : > { %p963_p10 = scmp.lt.s32.totalorder %s954_s25, %s954_s25 }
  0x32   : > { %p957_p8 = pnand %p955_p13, %p941_p2 }
  0x33   : > { %p964_p1 = por %p963_p10, %p962_p12 }
  0x34   : > { %p958_p3 = pneg %p957_p8 }
  0x36   : > { %p965_p4 = pnand %p964_p1, %p958_p3 }
  0x38   : > { %968 = shalt.err (!%p965_p4)
}
  0x39   : > { %s1072_s28 = smov [#allocation5]   ;;  %p1579_p5 = scmp.ne.s32.totalorder %s1574_s30, 0 }
  0x3a   : > { %859 = dma.vmem_to_smem (!%p1184_p0), %s156_s20, 16, %s1072_s28, [#allocation6]  }
  0x3b   : > { %176 = sbr.rel (%p1579_p5) target bundleno = 308 (0x134), region = 32  ;;  %p1580_p6 = scmp.ne.s32.totalorder (!%p1579_p5), %s1575_s4, 0 }
  0x40   : > { %1028 = dma.done.wait (%p1580_p6), [#allocation4], 32  }
  0x41   : > { %1030 = vsyncadd (%p1580_p6), [#allocation4], 4294967264 }
  0x42   : > { %1032 = dma.done.wait (%p1580_p6), [#allocation6], 16  }
  0x43   : > { %1034 = vsyncadd (%p1580_p6), [#allocation6], 4294967280 }
  0x44   : > { %186 = sfence }
  0x45   : > { %p205_p3 = scmp.lt.s32.totalorder %s1057_s16, 1  ;;  %s1209_s29 = smul.u32 36, %s1053_s15  ;;  %vm689_vm0 = vcmask 130048  }
  0x46   : > { %s1581_s0 = sld [smem:[#allocation14_spill]]  ;;  %s1225_s28 = sshll.u32 %s1053_s15, 2 }
  0x47   : > { %s206_s30 = scalar_select %p205_p3, %s1057_s16, 1 }
  0x48   : > { %s234_s5 = sadd.s32 2, %s1209_s29  ;;  %s219_s6 = sadd.s32 1, %s1209_s29 }
  0x49   : > { %s842_s7 = smul.u32 96, %s206_s30  ;;  %s235_s9 = sld [smem:[#allocation2 + %s234_s5]] }
  0x4a   : > { %s220_s4 = sld [smem:[#allocation2 + %s219_s6]]  ;;  %s258_s10 = sadd.s32 4, %s1209_s29 }
  0x4b   : > { %s259_s24 = sld [smem:[#allocation2 + %s258_s10]]  ;;  %s273_s25 = sadd.s32 5, %s1209_s29 }
  0x4c   : > { %s1218_s21 = scalar_lea.vmem %s1581_s0, %s842_s7  ;;  %s274_s30 = sld [smem:[#allocation2 + %s273_s25]] }
  0x4d   : > { %v1222_v0 = vld [vmem:[%s1218_s21] sm:$0xff]  ;;  %v1228_v1 = vld [vmem:[%s1218_s21 + $0x8] sm:$0xff]  ;;  %s297_s5 = sadd.s32 7, %s1209_s29  ;;  %s328_s6 = sadd.s32 1, %s1225_s28  ;;  %v818_v26 = vld [vmem:[%s1218_s21 + $0x18] sm:$0xff] }
  0x4e   : > { %s1559_s7 = smov 126   ;;  %s1561_s10 = smov 127   ;;  %v1239_v8 = vld [vmem:[%s1218_s21 + $0x9] sm:$0xff]  ;;  %v1242_v10 = vld [vmem:[%s1218_s21 + $0x1] sm:$0xff]  ;;  %v820_v34 = vld [vmem:[%s1218_s21 + $0x19] sm:$0xff] }
  0x4f   : > { %v236_v2 = vstv %s235_s9  ;;  %s298_s9 = sld [smem:[#allocation2 + %s297_s5]]  ;;  %s1245_s11 = smul.u32 9, %s328_s6  ;;  %v1257_v16 = vld [vmem:[%s1218_s21 + $0xa] sm:$0xff]  ;;  %v290_v18 = vld [vmem:[%s1218_s21 + $0x2] sm:$0xff]  ;;  %v822_v52 = vld [vmem:[%s1218_s21 + $0x1a] sm:$0xff] }
  0x50   : > { %v237_v3 = vmul.f32 %v236_v2, %v1222_v0  ;;  %v221_v4 = vstv %s220_s4  ;;  %v238_v6 = vmul.f32 %v236_v2, %v1228_v1  ;;  %s312_s4 = sadd.s32 8, %s1209_s29  ;;  %v819_v24 = vld [vmem:[%s1218_s21 + $0x20] sm:$0xff]  ;;  %s288_s0 = sadd.s32 6, %s1209_s29  ;;  %v825_v57 = vld [vmem:[%s1218_s21 + $0x38] sm:$0xff]  ;;  %v824_v58 = vld [vmem:[%s1218_s21 + $0x30] sm:$0xff] }
  0x51   : > { %v222_v5 = vmul.f32 %v221_v4, %v1222_v0  ;;  %v223_v7 = vmul.f32 %v221_v4, %v1228_v1  ;;  %v260_v9 = vstv %s259_s24  ;;  %s313_s20 = sld [smem:[#allocation2 + %s312_s4]]  ;;  %s339_s24 = sadd.s32 1, %s1245_s11  ;;  %v821_v31 = vld [vmem:[%s1218_s21 + $0x21] sm:$0xff] }
  0x52   : > { %241 = vrot.lane.b32.xlu1 %v237_v3, %s1559_s7  ;;  %v262_v11 = vmul.f32 %v260_v9, %v1239_v8  ;;  %v261_v12 = vmul.f32 %v260_v9, %v1242_v10  ;;  %v275_v13 = vstv %s274_s30  ;;  %s340_s25 = sld [smem:[#allocation2 + %s339_s24]]  ;;  %s354_s30 = sadd.s32 2, %s1245_s11  ;;  %v823_v51 = vld [vmem:[%s1218_s21 + $0x22] sm:$0xff] }
  0x53   : > { %226 = vrot.lane.b32.xlu0 %v222_v5, %s1561_s10  ;;  %v277_v14 = vmul.f32 %v275_v13, %v1239_v8  ;;  %v276_v15 = vmul.f32 %v275_v13, %v1242_v10  ;;  %s1264_s5 = sld [smem:[#allocation2 + %s354_s30]]  ;;  %s378_s6 = sadd.s32 4, %s1245_s11  ;;  %v827_v5 = vld [vmem:[%s1218_s21 + $0x39] sm:$0xff] }
  0x54   : > { %s393_s4 = sadd.s32 5, %s1245_s11  ;;  %s417_s24 = sadd.s32 7, %s1245_s11 }
  0x55   : > { %v299_v17 = vstv %s298_s9  ;;  %s1270_s9 = sld [smem:[#allocation2 + %s378_s6]]  ;;  %s249_s30 = sadd.s32 3, %s1209_s29 }
  0x56   : > { %243 = vrot.lane.b32.xlu1 %v238_v6, %s1559_s7  ;;  %v301_v19 = vmul.f32 %v299_v17, %v1257_v16  ;;  %v300_v20 = vmul.f32 %v299_v17, %v290_v18  ;;  %s1582_s6 = smov 126   ;;  %s447_s1 = sadd.s32 2, %s1225_s28  ;;  %v826_v6 = vld [vmem:[%s1218_s21 + $0x31] sm:$0xff] }
  0x57   : > { %228 = vrot.lane.b32.xlu0 %v223_v7, %s1561_s10  ;;  %v314_v21 = vstv %s313_s20  ;;  %s1276_s20 = sld [smem:[#allocation2 + %s393_s4]]  ;;  %s369_s4 = sadd.s32 3, %s1245_s11  ;;  %v828_v17 = vld [vmem:[%s1218_s21 + $0x32] sm:$0xff] }
  0x58   : > { %v316_v22 = vmul.f32 %v314_v21, %v1257_v16  ;;  %v315_v23 = vmul.f32 %v314_v21, %v290_v18  ;;  %v341_v25 = vstv %s340_s25  ;;  %s250_s25 = sld [smem:[#allocation2 + %s249_s30]]  ;;  %s408_s23 = sadd.s32 6, %s1245_s11 }
  0x59   : > { %v343_v27 = vmul.f32 %v819_v24, %v341_v25  ;;  %v342_v28 = vmul.f32 %v818_v26, %v341_v25  ;;  %v356_v29 = vstv %s1264_s5  ;;  %s289_s2 = sld [smem:[#allocation2 + %s288_s0]]  ;;  %s1583_s22 = smov 127  }
  0x5a   : > { %267 = vrot.lane.b32.xlu1 %v262_v11, %s1561_s10  ;;  %v358_v30 = vmul.f32 %v819_v24, %v356_v29  ;;  %s1295_s18 = smul.u32 9, %s447_s1  ;;  %v357_v33 = vmul.f32 %v818_v26, %v356_v29  ;;  %s1299_s5 = sld [smem:[#allocation2 + %s408_s23]] }
  0x5b   : > { %265 = vrot.lane.b32.xlu0 %v261_v12, %s1561_s10  ;;  %v380_v32 = vstv %s1270_s9  ;;  %s432_s0 = sadd.s32 8, %s1245_s11  ;;  %p1584_p10 = scmp.ne.s32.totalorder %s1571_s26, 0 }
  0x5c   : > { %s1303_s30 = sld [smem:[#allocation2 + %s1295_s18]]  ;;  %v382_v36 = vmul.f32 %v821_v31, %v380_v32  ;;  %v381_v40 = vmul.f32 %v820_v34, %v380_v32  ;;  %s458_s23 = sadd.s32 1, %s1295_s18 }
  0x5d   : > { %v395_v44 = vstv %s1276_s20  ;;  %s1320_s1 = sld [smem:[#allocation2 + %s432_s0]]  ;;  %s473_s9 = sadd.s32 2, %s1295_s18 }
  0x5e   : > { %282 = vrot.lane.b32.xlu1 %v277_v14, %s1559_s7  ;;  %v253_v39 = vstv %s250_s25  ;;  %v397_v56 = vmul.f32 %v821_v31, %v395_v44  ;;  %v396_v62 = vmul.f32 %v820_v34, %v395_v44  ;;  %s1361_s20 = sld [smem:[#allocation2 + %s473_s9]]  ;;  %s497_s25 = sadd.s32 4, %s1295_s18 }
  0x5f   : > { %280 = vrot.lane.b32.xlu0 %v276_v15, %s1559_s7  ;;  %s1279_s7 = sld [smem:[#allocation2 + %s417_s24]]  ;;  %v1313_v41 = vmul.f32 %v253_v39, %v1239_v8  ;;  %v1316_v42 = vmul.f32 %v253_v39, %v1242_v10  ;;  %v292_v43 = vstv %s289_s2 }
  0x60   : > { %s1290_s24 = sld [smem:[#allocation2 + %s1245_s11]]  ;;  %v1324_v45 = vmul.f32 %v292_v43, %v1257_v16  ;;  %v1326_v46 = vmul.f32 %v292_v43, %v290_v18  ;;  %v412_v55 = vstv %s1299_s5  ;;  %s566_s5 = sadd.s32 3, %s1225_s28  ;;  %v829_v16 = vld [vmem:[%s1218_s21 + $0x3a] sm:$0xff]  ;;  %v832_v43 = vld [vmem:[%s1218_s21 + $0x49] sm:$0xff] }
  0x61   : > { %s1342_s2 = sld [smem:[#allocation2 + %s458_s23]]  ;;  %v1345_v59 = vmul.f32 %v823_v51, %v412_v55  ;;  %v1347_v60 = vmul.f32 %v822_v52, %v412_v55 }
  0x62   : > { %306 = vrot.lane.b32.xlu1 %v301_v19, %s1561_s10  ;;  %v453_v61 = vstv %s1303_s30  ;;  %s536_s30 = sadd.s32 7, %s1295_s18 }
  0x63   : > { %304 = vrot.lane.b32.xlu0 %v300_v20, %s1561_s10  ;;  %s211_s10 = sld [smem:[#allocation2 + %s1209_s29]]  ;;  %v434_v4 = vstv %s1320_s1  ;;  %s1386_s1 = smul.u32 9, %s566_s5 }
  0x64   : > { %s370_s29 = sld [smem:[#allocation2 + %s369_s4]]  ;;  %v436_v8 = vmul.f32 %v823_v51, %v434_v4  ;;  %s527_s4 = sadd.s32 6, %s1295_s18  ;;  %v435_v11 = vmul.f32 %v822_v52, %v434_v4  ;;  %v475_v15 = vstv %s1361_s20 }
  0x65   : > { %v419_v63 = vstv %s1279_s7  ;;  %s1367_s7 = sld [smem:[#allocation2 + %s497_s25]]  ;;  %v477_v19 = vmul.f32 %v825_v57, %v475_v15  ;;  %s607_s9 = sadd.s32 3, %s1386_s1 }
  0x66   : > { %321 = vrot.lane.b32.xlu1 %v316_v22, %s1582_s6  ;;  %v334_v47 = vstv %s1290_s24  ;;  %v421_v2 = vmul.f32 %v823_v51, %v419_v63  ;;  %v420_v3 = vmul.f32 %v822_v52, %v419_v63  ;;  %s528_s24 = sld [smem:[#allocation2 + %s527_s4]]  ;;  %v476_v22 = vmul.f32 %v824_v58, %v475_v15  ;;  %s592_s25 = sadd.s32 2, %s1386_s1 }
  0x67   : > { %319 = vrot.lane.b32.xlu0 %v315_v23, %s1582_s6  ;;  %v1329_v48 = vmul.f32 %v819_v24, %v334_v47  ;;  %v1331_v49 = vmul.f32 %v818_v26, %v334_v47  ;;  %v460_v12 = vstv %s1342_s2  ;;  %s1389_s28 = sld [smem:[#allocation2 + %s536_s30]]  ;;  %s551_s2 = sadd.s32 8, %s1295_s18 }
  0x68   : > { %v462_v13 = vmul.f32 %v825_v57, %v460_v12  ;;  %v461_v14 = vmul.f32 %v824_v58, %v460_v12  ;;  %s568_s23 = sld [smem:[#allocation2 + %s1386_s1]]  ;;  %s616_s4 = sadd.s32 4, %s1386_s1 }
  0x69   : > { %v214_v35 = vstv %s211_s10  ;;  %s488_s10 = sadd.s32 3, %s1295_s18  ;;  %s608_s20 = sld [smem:[#allocation2 + %s607_s9]] }
  0x6a   : > { %348 = vrot.lane.b32.xlu1 %v343_v27, %s1583_s22  ;;  %v1306_v37 = vmul.f32 %v214_v35, %v1222_v0  ;;  %v1309_v38 = vmul.f32 %v214_v35, %v1228_v1  ;;  %v373_v50 = vstv %s370_s29  ;;  %v1353_v0 = vmul.f32 %v825_v57, %v453_v61  ;;  %s489_s11 = sld [smem:[#allocation2 + %s488_s10]]  ;;  %s512_s29 = sadd.s32 5, %s1295_s18  ;;  %v831_v27 = vld [vmem:[%s1218_s21 + $0x50] sm:$0xff] }
  0x6b   : > { %346 = vrot.lane.b32.xlu0 %v342_v28, %s1583_s22  ;;  %v1335_v53 = vmul.f32 %v821_v31, %v373_v50  ;;  %v1337_v54 = vmul.f32 %v820_v34, %v373_v50  ;;  %v1355_v1 = vmul.f32 %v824_v58, %v453_v61  ;;  %s1381_s0 = sld [smem:[#allocation2 + %s512_s29]]  ;;  %v499_v23 = vstv %s1367_s7  ;;  %v830_v28 = vld [vmem:[%s1218_s21 + $0x48] sm:$0xff]  ;;  %s646_s29 = sadd.s32 6, %s1386_s1  ;;  %v835_v61 = vld [vmem:[%s1218_s21 + $0x52] sm:$0xff] }
  0x6c   : > { %v531_v18 = vstv %s528_s24  ;;  %v501_v24 = vmul.f32 %v827_v5, %v499_v23  ;;  %v500_v25 = vmul.f32 %v826_v6, %v499_v23  ;;  %s1402_s10 = sld [smem:[#allocation2 + %s551_s2]]  ;;  %s670_s2 = sadd.s32 8, %s1386_s1 }
  0x6d   : > { %v1391_v20 = vmul.f32 %v829_v16, %v531_v18  ;;  %v1393_v21 = vmul.f32 %v828_v17, %v531_v18  ;;  %v538_v34 = vstv %s1389_s28  ;;  %s1421_s7 = sld [smem:[#allocation2 + %s592_s25]]  ;;  %s655_s28 = sadd.s32 7, %s1386_s1 }
  0x6e   : > { %363 = vrot.lane.b32.xlu1 %v358_v30, %s1582_s6  ;;  %v572_v29 = vstv %s568_s23  ;;  %v540_v35 = vmul.f32 %v829_v16, %v538_v34  ;;  %s1427_s24 = sld [smem:[#allocation2 + %s616_s4]] }
  0x6f   : > { %361 = vrot.lane.b32.xlu0 %v357_v33, %s1582_s6  ;;  %v1410_v31 = vmul.f32 %v831_v27, %v572_v29  ;;  %v1412_v32 = vmul.f32 %v830_v28, %v572_v29  ;;  %v611_v44 = vstv %s608_s20  ;;  %s647_s5 = sld [smem:[#allocation2 + %s646_s29]]  ;;  %s1075_s29 = smov [#allocation7]  }
  0x70   : > { %v492_v7 = vstv %s489_s11  ;;  %s577_s11 = sadd.s32 1, %s1386_s1  ;;  %v1431_v51 = vmul.f32 %v832_v43, %v611_v44  ;;  %s656_s23 = sld [smem:[#allocation2 + %s655_s28]] }
  0x71   : > { %v1369_v9 = vmul.f32 %v827_v5, %v492_v7  ;;  %v1371_v10 = vmul.f32 %v826_v6, %v492_v7  ;;  %v514_v26 = vstv %s1381_s0  ;;  %s1408_s18 = sld [smem:[#allocation2 + %s577_s11]]  ;;  %s631_s0 = sadd.s32 5, %s1386_s1 }
  0x72   : > { %387 = vrot.lane.b32.xlu1 %v382_v36, %s1583_s22  ;;  %v516_v30 = vmul.f32 %v827_v5, %v514_v26  ;;  %v515_v33 = vmul.f32 %v826_v6, %v514_v26  ;;  %v539_v36 = vmul.f32 %v828_v17, %v538_v34  ;;  %v553_v39 = vstv %s1402_s10  ;;  %s632_s30 = sld [smem:[#allocation2 + %s631_s0]]  ;;  %s837_s10 = sshll.u32 %s1053_s15, 1 }
  0x73   : > { %385 = vrot.lane.b32.xlu0 %v381_v40, %s1583_s22  ;;  %v833_v40 = vld [vmem:[%s1218_s21 + $0x51] sm:$0xff]  ;;  %v555_v47 = vmul.f32 %v829_v16, %v553_v39  ;;  %v554_v52 = vmul.f32 %v828_v17, %v553_v39  ;;  %v594_v58 = vstv %s1421_s7  ;;  %s838_s11 = sshll.u32 %s1057_s16, 3 }
  0x74   : > { %v1429_v50 = vmul.f32 %v833_v40, %v611_v44  ;;  %v595_v5 = vmul.f32 %v830_v28, %v594_v58  ;;  %v618_v6 = vstv %s1427_s24 }
  0x75   : > { %v650_v63 = vstv %s647_s5  ;;  %v620_v7 = vmul.f32 %v833_v40, %v618_v6  ;;  %s973_s5 = sshll.u32 %s1075_s29, 4  ;;  %s974_s5 = int_to_ptr.vmem [resolvable:$false] %s973_s5 }
  0x76   : > { %402 = vrot.lane.b32.xlu1 %v397_v56, %s1582_s6  ;;  %s975_s0 = scalar_lea.vmem %s974_s5, 512 }
  0x77   : > { %400 = vrot.lane.b32.xlu0 %v396_v62, %s1582_s6  ;;  %v579_v55 = vstv %s1408_s18  ;;  %v834_v62 = vld [vmem:[%s1218_s21 + $0x4a] sm:$0xff]  ;;  %s671_s21 = sld [smem:[#allocation2 + %s670_s2]]  ;;  %s705_s18 = sadd.s32 %s838_s11, %s837_s10 }
  0x78   : > { %v581_v56 = vmul.f32 %v831_v27, %v579_v55  ;;  %v580_v57 = vmul.f32 %v830_v28, %v579_v55  ;;  %v1446_v4 = vmul.f32 %v834_v62, %v650_v63  ;;  %s839_s25 = sshll.u32 %s705_s18, 7 }
  0x79   : > { %s1494_s7 = scalar_lea.hbm %s1554_s3, %s839_s25 }
  0x7a   : > { %426 = vrot.lane.b32.xlu1 %v421_v2, %s1583_s22  ;;  %v596_v2 = vmul.f32 %v831_v27, %v594_v58 }
  0x7b   : > { %424 = vrot.lane.b32.xlu0 %v420_v3, %s1583_s22  ;;  %v1444_v3 = vmul.f32 %v835_v61, %v650_v63 }
  0x7d   : > { %v672_v17 = vstv %s671_s21 }
  0x7e   : > { %441 = vrot.lane.b32.xlu1 %v436_v8, %s1582_s6  ;;  %v619_v8 = vmul.f32 %v832_v43, %v618_v6  ;;  %v674_v18 = vmul.f32 %v835_v61, %v672_v17 }
  0x7f   : > { %439 = vrot.lane.b32.xlu0 %v435_v11, %s1582_s6  ;;  %v633_v11 = vstv %s632_s30 }
  0x80   : > { %v635_v12 = vmul.f32 %v833_v40, %v633_v11 }
  0x82   : > { %467 = vrot.lane.b32.xlu1 %v462_v13, %s1583_s22  ;;  %v634_v13 = vmul.f32 %v832_v43, %v633_v11 }
  0x83   : > { %465 = vrot.lane.b32.xlu0 %v461_v14, %s1583_s22  ;;  %v657_v14 = vstv %s656_s23 }
  0x84   : > { %v659_v15 = vmul.f32 %v835_v61, %v657_v14  ;;  %v658_v16 = vmul.f32 %v834_v62, %v657_v14 }
  0x86   : > { %482 = vrot.lane.b32.xlu1 %v477_v19, %s1582_s6  ;;  %v673_v19 = vmul.f32 %v834_v62, %v672_v17 }
  0x87   : > { %480 = vrot.lane.b32.xlu0 %v476_v22, %s1582_s6 }
  0x8a   : > { %506 = vrot.lane.b32.xlu1 %v501_v24, %s1583_s22 }
  0x8b   : > { %504 = vrot.lane.b32.xlu0 %v500_v25, %s1583_s22 }
  0x8e   : > { %521 = vrot.lane.b32.xlu1 %v516_v30, %s1582_s6 }
  0x8f   : > { %519 = vrot.lane.b32.xlu0 %v515_v33, %s1582_s6 }
  0x92   : > { %545 = vrot.lane.b32.xlu1 %v540_v35, %s1583_s22 }
  0x93   : > { %543 = vrot.lane.b32.xlu0 %v539_v36, %s1583_s22 }
  0x96   : > { %560 = vrot.lane.b32.xlu1 %v555_v47, %s1582_s6 }
  0x97   : > { %558 = vrot.lane.b32.xlu0 %v554_v52, %s1582_s6 }
  0x9a   : > { %586 = vrot.lane.b32.xlu1 %v581_v56, %s1583_s22 }
  0x9b   : > { %584 = vrot.lane.b32.xlu0 %v580_v57, %s1583_s22 }
  0x9e   : > { %601 = vrot.lane.b32.xlu1 %v596_v2, %s1582_s6 }
  0x9f   : > { %599 = vrot.lane.b32.xlu0 %v595_v5, %s1582_s6 }
  0xa2   : > { %625 = vrot.lane.b32.xlu1 %v620_v7, %s1583_s22 }
  0xa3   : > { %623 = vrot.lane.b32.xlu0 %v619_v8, %s1583_s22 }
  0xa6   : > { %640 = vrot.lane.b32.xlu1 %v635_v12, %s1582_s6 }
  0xa7   : > { %638 = vrot.lane.b32.xlu0 %v634_v13, %s1582_s6 }
  0xaa   : > { %664 = vrot.lane.b32.xlu1 %v659_v15, %s1583_s22 }
  0xab   : > { %662 = vrot.lane.b32.xlu0 %v658_v16, %s1583_s22  ;;  %s202_s22 = sand.u32 1, %s1045_s13  }
  0xac   : > { %s815_s1 = sshll.u32 %s202_s22, 4  ;;  %s1500_s4 = scalar_lea.sflag [#allocation3], %s202_s22 }
  0xad   : > { %s204_s9 = scalar_lea.vmem [#allocation7], %s815_s1 }
  0xae   : > { %679 = vrot.lane.b32.xlu1 %v674_v18, %s1582_s6  ;;  %s708_s20 = sshll.u32 %s204_s9, 4  ;;  %s1496_s20 = int_to_ptr.vmem [resolvable:$true] %s708_s20 }
  0xaf   : > { %677 = vrot.lane.b32.xlu0 %v673_v19, %s1582_s6  ;;  %s685_s6 = sld [smem:[#allocation5 + %s1053_s15]]  ;;  %s969_s24 = scalar_lea.vmem %s1496_s20, 256 }
  0xb0   : > { %p970_p8 = scmp.ne.s32.totalorder %s1496_s20, %s969_s24  ;;  %p976_p2 = scmp.lt.s32.totalorder %s1496_s20, %s974_s5 }
  0xb1   : > { %p977_p7 = scmp.lt.s32.totalorder %s975_s0, %s969_s24 }
  0xb2   : > { %p971_p12 = pnand %p970_p8, %p1584_p10 }
  0xb3   : > { %p978_p9 = por %p977_p7, %p976_p2 }
  0xb4   : > { %p972_p0 = pneg %p971_p12 }
  0xb6   : > { %p979_p11 = pnand %p978_p9, %p972_p0 }
  0xc4   : > { %v242_v22 = vpop.permute.xlu1 %241 }
  0xc5   : > { %v227_v23 = vpop.permute.xlu0 %226 }
  0xc6   : > { %v232_v24 = vadd.f32 %v227_v23, %v1306_v37 }
  0xc8   : > { %v247_v25 = vadd.f32 %v242_v22, %v232_v24  ;;  %v244_v26 = vpop.permute.xlu1 %243 }
  0xc9   : > { %v229_v27 = vpop.permute.xlu0 %228 }
  0xca   : > { %v233_v28 = vadd.f32 %v229_v27, %v1309_v38  ;;  %v256_v29 = vadd.f32 %v1316_v42, %v247_v25 }
  0xcc   : > { %v248_v30 = vadd.f32 %v244_v26, %v233_v28  ;;  %v268_v33 = vpop.permute.xlu1 %267 }
  0xcd   : > { %v266_v34 = vpop.permute.xlu0 %265 }
  0xce   : > { %v257_v35 = vadd.f32 %v1313_v41, %v248_v30  ;;  %v271_v39 = vadd.f32 %v266_v34, %v256_v29 }
  0xd0   : > { %v272_v36 = vadd.f32 %v268_v33, %v257_v35  ;;  %v283_v40 = vpop.permute.xlu1 %282 }
  0xd1   : > { %v281_v43 = vpop.permute.xlu0 %280 }
  0xd2   : > { %v287_v44 = vadd.f32 %v283_v40, %v272_v36  ;;  %v286_v47 = vadd.f32 %v281_v43, %v271_v39 }
  0xd4   : > { %v307_v52 = vpop.permute.xlu1 %306  ;;  %v296_v37 = vadd.f32 %v1324_v45, %v287_v44  ;;  %v295_v55 = vadd.f32 %v1326_v46, %v286_v47 }
  0xd5   : > { %v305_v56 = vpop.permute.xlu0 %304 }
  0xd6   : > { %v311_v38 = vadd.f32 %v307_v52, %v296_v37  ;;  %v310_v57 = vadd.f32 %v305_v56, %v295_v55 }
  0xd8   : > { %v322_v42 = vpop.permute.xlu1 %321 }
  0xd9   : > { %v326_v58 = vadd.f32 %v322_v42, %v311_v38  ;;  %v320_v61 = vpop.permute.xlu0 %319 }
  0xda   : > { %v325_v62 = vadd.f32 %v320_v61, %v310_v57 }
  0xdb   : > { %v338_v41 = vadd.f32 %v1329_v48, %v326_v58 }
  0xdc   : > { %v349_v63 = vpop.permute.xlu1 %348  ;;  %v337_v2 = vadd.f32 %v1331_v49, %v325_v62 }
  0xdd   : > { %v347_v5 = vpop.permute.xlu0 %346  ;;  %v353_v6 = vadd.f32 %v349_v63, %v338_v41 }
  0xde   : > { %v352_v7 = vadd.f32 %v347_v5, %v337_v2 }
  0xe0   : > { %v364_v8 = vpop.permute.xlu1 %363 }
  0xe1   : > { %v368_v11 = vadd.f32 %v364_v8, %v353_v6  ;;  %v362_v45 = vpop.permute.xlu0 %361 }
  0xe2   : > { %v367_v12 = vadd.f32 %v362_v45, %v352_v7 }
  0xe3   : > { %v377_v46 = vadd.f32 %v1335_v53, %v368_v11 }
  0xe4   : > { %v388_v13 = vpop.permute.xlu1 %387  ;;  %v376_v14 = vadd.f32 %v1337_v54, %v367_v12 }
  0xe5   : > { %v386_v15 = vpop.permute.xlu0 %385  ;;  %v392_v16 = vadd.f32 %v388_v13, %v377_v46 }
  0xe6   : > { %v391_v17 = vadd.f32 %v386_v15, %v376_v14 }
  0xe8   : > { %v403_v18 = vpop.permute.xlu1 %402 }
  0xe9   : > { %v407_v48 = vadd.f32 %v403_v18, %v392_v16  ;;  %v401_v19 = vpop.permute.xlu0 %400 }
  0xea   : > { %v406_v22 = vadd.f32 %v401_v19, %v391_v17 }
  0xeb   : > { %v416_v49 = vadd.f32 %v1345_v59, %v407_v48 }
  0xec   : > { %v427_v23 = vpop.permute.xlu1 %426  ;;  %v415_v24 = vadd.f32 %v1347_v60, %v406_v22 }
  0xed   : > { %v425_v25 = vpop.permute.xlu0 %424  ;;  %v431_v26 = vadd.f32 %v427_v23, %v416_v49 }
  0xee   : > { %v430_v27 = vadd.f32 %v425_v25, %v415_v24 }
  0xf0   : > { %v442_v28 = vpop.permute.xlu1 %441 }
  0xf1   : > { %v446_v53 = vadd.f32 %v442_v28, %v431_v26  ;;  %v440_v29 = vpop.permute.xlu0 %439  ;;  %v686_v26 = vstv %s685_s6 }
  0xf2   : > { %v445_v30 = vadd.f32 %v440_v29, %v430_v27 }
  0xf3   : > { %v457_v54 = vadd.f32 %v1353_v0, %v446_v53 }
  0xf4   : > { %v468_v33 = vpop.permute.xlu1 %467  ;;  %v456_v34 = vadd.f32 %v1355_v1, %v445_v30 }
  0xf5   : > { %v466_v35 = vpop.permute.xlu0 %465  ;;  %v472_v36 = vadd.f32 %v468_v33, %v457_v54 }
  0xf6   : > { %v471_v39 = vadd.f32 %v466_v35, %v456_v34 }
  0xf8   : > { %v483_v40 = vpop.permute.xlu1 %482 }
  0xf9   : > { %v487_v59 = vadd.f32 %v483_v40, %v472_v36  ;;  %v481_v43 = vpop.permute.xlu0 %480 }
  0xfa   : > { %v486_v44 = vadd.f32 %v481_v43, %v471_v39 }
  0xfb   : > { %v496_v60 = vadd.f32 %v1369_v9, %v487_v59 }
  0xfc   : > { %v507_v47 = vpop.permute.xlu1 %506  ;;  %v495_v52 = vadd.f32 %v1371_v10, %v486_v44 }
  0xfd   : > { %v505_v37 = vpop.permute.xlu0 %504  ;;  %v511_v55 = vadd.f32 %v507_v47, %v496_v60 }
  0xfe   : > { %v510_v56 = vadd.f32 %v505_v37, %v495_v52 }
 0x100   : > { %v522_v38 = vpop.permute.xlu1 %521 }
 0x101   : > { %v526_v0 = vadd.f32 %v522_v38, %v511_v55  ;;  %v520_v57 = vpop.permute.xlu0 %519 }
 0x102   : > { %v525_v42 = vadd.f32 %v520_v57, %v510_v56 }
 0x103   : > { %v535_v1 = vadd.f32 %v1391_v20, %v526_v0 }
 0x104   : > { %v546_v58 = vpop.permute.xlu1 %545  ;;  %v534_v61 = vadd.f32 %v1393_v21, %v525_v42 }
 0x105   : > { %v544_v62 = vpop.permute.xlu0 %543  ;;  %v550_v41 = vadd.f32 %v546_v58, %v535_v1 }
 0x106   : > { %v549_v63 = vadd.f32 %v544_v62, %v534_v61 }
 0x108   : > { %v561_v2 = vpop.permute.xlu1 %560 }
 0x109   : > { %v565_v9 = vadd.f32 %v561_v2, %v550_v41  ;;  %v559_v5 = vpop.permute.xlu0 %558 }
 0x10a   : > { %v564_v10 = vadd.f32 %v559_v5, %v549_v63 }
 0x10b   : > { %v576_v6 = vadd.f32 %v1410_v31, %v565_v9 }
 0x10c   : > { %v587_v7 = vpop.permute.xlu1 %586  ;;  %v575_v8 = vadd.f32 %v1412_v32, %v564_v10 }
 0x10d   : > { %v585_v11 = vpop.permute.xlu0 %584  ;;  %v591_v45 = vadd.f32 %v587_v7, %v576_v6 }
 0x10e   : > { %v590_v20 = vadd.f32 %v585_v11, %v575_v8 }
 0x110   : > { %v602_v12 = vpop.permute.xlu1 %601 }
 0x111   : > { %v606_v21 = vadd.f32 %v602_v12, %v591_v45  ;;  %v600_v46 = vpop.permute.xlu0 %599 }
 0x112   : > { %v605_v13 = vadd.f32 %v600_v46, %v590_v20 }
 0x113   : > { %v615_v14 = vadd.f32 %v1429_v50, %v606_v21 }
 0x114   : > { %v626_v15 = vpop.permute.xlu1 %625  ;;  %v614_v16 = vadd.f32 %v1431_v51, %v605_v13 }
 0x115   : > { %v624_v31 = vpop.permute.xlu0 %623  ;;  %v630_v17 = vadd.f32 %v626_v15, %v615_v14 }
 0x116   : > { %v629_v32 = vadd.f32 %v624_v31, %v614_v16 }
 0x118   : > { %v641_v18 = vpop.permute.xlu1 %640 }
 0x119   : > { %v645_v48 = vadd.f32 %v641_v18, %v630_v17  ;;  %v639_v19 = vpop.permute.xlu0 %638 }
 0x11a   : > { %v644_v22 = vadd.f32 %v639_v19, %v629_v32 }
 0x11b   : > { %v654_v49 = vadd.f32 %v1444_v3, %v645_v48 }
 0x11c   : > { %v665_v23 = vpop.permute.xlu1 %664  ;;  %v653_v50 = vadd.f32 %v1446_v4, %v644_v22 }
 0x11d   : > { %v663_v24 = vpop.permute.xlu0 %662  ;;  %v669_v51 = vadd.f32 %v665_v23, %v654_v49 }
 0x11e   : > { %v668_v25 = vadd.f32 %v663_v24, %v653_v50 }
 0x120   : > { %v680_v27 = vpop.permute.xlu1 %679 }
 0x121   : > { %v684_v28 = vadd.f32 %v680_v27, %v669_v51  ;;  %v678_v53 = vpop.permute.xlu0 %677 }
 0x122   : > { %v683_v29 = vadd.f32 %v678_v53, %v668_v25 }
 0x123   : > { %v688_v30 = vadd.f32 %v686_v26, %v684_v28 }
 0x124   : > { %v687_v3 = vadd.f32 %v686_v26, %v683_v29 }
 0x125   : > { %691 = vst.msk [vmem:[%s204_s9 + $0x8] sm:$0xff] %vm689_vm0, %v688_v30 }
 0x126   : > { %690 = vst.msk [vmem:[%s204_s9] sm:$0xff] %vm689_vm0, %v687_v3 }
 0x127   : > { %982 = shalt.err (!%p979_p11)
}
 0x128   : > { %s983_s30 = scalar_lea.hbm %s1494_s7, 256  ;;  %s987_s2 = scalar_lea.hbm %s1554_s3, 2048 }
 0x129   : > { %p984_p13 = scmp.ne.s32.totalorder %s1494_s7, %s983_s30  ;;  %p988_p5 = scmp.lt.s32.totalorder %s1494_s7, %s1554_s3 }
 0x12a   : > { %p989_p6 = scmp.lt.s32.totalorder %s987_s2, %s983_s30 }
 0x12b   : > { %p985_p1 = pnand %p984_p13, %p1584_p10 }
 0x12c   : > { %p990_p3 = por %p989_p6, %p988_p5 }
 0x12d   : > { %p986_p4 = pneg %p985_p1 }
 0x12f   : > { %p991_p8 = pnand %p990_p3, %p986_p4 }
 0x131   : > { %994 = shalt.err (!%p991_p8)
}
 0x132   : > { %s1076_s6 = smov 128   ;;  %s1077_s1 = smov 8  }
 0x133   : > { %851 = dma.vmem_to_hbm [thread:$0]  (%p1584_p10), %s1496_s20, 256, %s1494_s7, %s1500_s4, %s1076_s6, %s1076_s6, %s1077_s1  }
 0x134 PF: > { %p868_p12 = scmp.ge.s32.totalorder %s1069_s19, 2  ;;  %s723_s10 = sand.u32 1, %s1041_s12  }
 0x135   : > { %p1585_p0 = scmp.ne.s32.totalorder %s1573_s27, 0  ;;  %s724_s11 = scalar_lea.sflag [#allocation3], %s723_s10 }
 0x137   : > { %p861_p2 = pnand %p868_p12, %p1585_p0 }
 0x139   : > { %p862_p7 = pneg %p861_p2 }
 0x13b   : > { %1036 = dma.done.wait (%p862_p7), %s724_s11, 256  }
 0x13c   : > { %1038 = vsyncadd (%p862_p7), %s724_s11, 4294967040  ;;  %s18_s19 = sadd.s32 1, %s1069_s19   ;;  %s1586_s16 = sld [smem:[#allocation11_spill]] }
 0x13d   : > { %p15_p9 = scmp.ge.s32.totalorder %s18_s19, 10   ;;  %s1587_s26 = sld [smem:[#allocation12_spill]] }
 0x13e   : > { %s1588_s18 = sld [smem:[#allocation13_spill]]  ;;  %s1589_s12 = smov %s1045_s13 }
 0x13f   : > { %s1590_s13 = smov %s1049_s14  ;;  %s1591_s14 = smov %s1180_s8 }
 0x140   : > { %s1592_s15 = smov %s1061_s17  ;;  %17 = sbr.rel (!%p15_p9) target bundleno = 11 (0xb), region = 79 }
 0x143   : > { %s1593_s17 = smov %s1587_s26 }
 0x145   :  { %729 = vsyncpa [#allocation3], 1 }
 0x146   :  { %731 = vsyncpa [#allocation3 + $0x1], 1 }
 0x147   :  { %732 = vsyncpa [#allocation4], 1 }
 0x148   :  { %734 = vsyncpa [#allocation4 + $0x1], 1 }
 0x149   :  { %735 = vsyncpa [#allocation6], 1 }

</bundles_post_ra>
